<compile_context>
chip_gen: v7x
topology: tpu7x:2x2x1
jax: 0.10.0
libtpu: 0.0.40
codegen_flags: <defaults>
</compile_context>

<pallas_src>
import math

import jax
import jax.numpy as jnp
from jax.experimental import pallas as pl
from jax.experimental.pallas import tpu as pltpu


_MASK_VALUE = -0.7 * float(jnp.finfo(jnp.float32).max)  # large finite negative (NaN-safe)
_LINEAR_VMEM_LIMIT = 48 * 1024 * 1024   # projections: large tiles, still safe on v7x (64 MiB/TC)
_FLASH_VMEM_LIMIT = 32 * 1024 * 1024    # attention: per-step blocks are small (<10 MiB GPT-2 size)


def _largest_divisor_tile(dim, max_tile):
    """Largest tile <= max_tile dividing `dim`; prefer multiples of 128, then 8."""
    if dim <= max_tile:
        return dim
    for align in (128, 8, 1):
        t = (max_tile // align) * align
        while t >= align:
            if dim % t == 0:
                return t
            t -= align
    return dim  # unreachable: align=1 always finds a divisor


# ---------------------------------------------------------------------------
# Tiled linear:  out = x @ w + b     (used for c_attn and c_proj)
# ---------------------------------------------------------------------------
def _linear_kernel(x_ref, w_ref, b_ref, o_ref, acc_ref):
    k = pl.program_id(2)

    @pl.when(k == 0)
    def _init():
        acc_ref[...] = jnp.zeros(acc_ref.shape, acc_ref.dtype)

    acc_ref[...] += jnp.dot(x_ref[...], w_ref[...],
                            preferred_element_type=jnp.float32)

    @pl.when(k == pl.num_programs(2) - 1)
    def _finalize():
        o_ref[...] = (acc_ref[...] + b_ref[...]).astype(o_ref.dtype)


def _linear(x, w, b, *, out_dtype=None):
    M, K = x.shape
    K2, N = w.shape
    assert K == K2
    out_dtype = out_dtype if out_dtype is not None else x.dtype
    b = b.reshape(1, N)

    # Bigger tiles -> fewer re-reads: x is streamed N/tn times, w is streamed M/tm times.
    # 1152 divides 3C for GPT-2-style C (e.g. 3*768=2304), so x is streamed only 2x there.
    tm = _largest_divisor_tile(M, 1024)
    tn = _largest_divisor_tile(N, 1152)
    tk = _largest_divisor_tile(K, 1024)

    return pl.pallas_call(
        _linear_kernel,
        out_shape=jax.ShapeDtypeStruct((M, N), out_dtype),
        grid_spec=pltpu.PrefetchScalarGridSpec(
            num_scalar_prefetch=0,
            grid=(M // tm, N // tn, K // tk),
            in_specs=[
                pl.BlockSpec((tm, tk), lambda i, j, k: (i, k)),   # x
                pl.BlockSpec((tk, tn), lambda i, j, k: (k, j)),   # w
                pl.BlockSpec((1, tn), lambda i, j, k: (0, j)),    # b
            ],
            out_specs=pl.BlockSpec((tm, tn), lambda i, j, k: (i, j)),
            scratch_shapes=[pltpu.VMEM((tm, tn), jnp.float32)],
        ),
        compiler_params=pltpu.CompilerParams(
            dimension_semantics=("parallel", "parallel", "arbitrary"),
            vmem_limit_bytes=_LINEAR_VMEM_LIMIT,
        ),
    )(x, w, b)


# ---------------------------------------------------------------------------
# Flash-style causal attention reading q/k/v from the fused qkv buffer
#   qkv view: (B, T, 3, H, hd)   output: (B, T, H, hd)
# ---------------------------------------------------------------------------
def _flash_attn_kernel(q_ref, k_ref, v_ref, o_ref, q_s, m_ref, l_ref, acc_ref):
    _, block_q, _, H, hd = q_ref.shape
    block_kv = k_ref.shape[1]
    sm_scale = 1.0 / math.sqrt(hd)

    qi = pl.program_id(1)
    kj = pl.program_id(2)
    q_start = qi * block_q
    kv_start = kj * block_kv

    @pl.when(kj == 0)
    def _init():
        # Stage q ONCE per q tile: head-major (H, bq, hd), pre-scaled by 1/sqrt(hd).
        q = q_ref[...].reshape(block_q, H, hd)
        q_s[...] = (jnp.swapaxes(q, 0, 1) * sm_scale).astype(q_s.dtype)
        m_ref[...] = jnp.full(m_ref.shape, _MASK_VALUE, m_ref.dtype)
        l_ref[...] = jnp.zeros(l_ref.shape, l_ref.dtype)
        acc_ref[...] = jnp.zeros(acc_ref.shape, acc_ref.dtype)

    def update(apply_mask):
        q = q_s[...]                                                   # (H, bq, hd)
        k = jnp.swapaxes(k_ref[...].reshape(block_kv, H, hd), 0, 1)    # (H, bkv, hd)
        v = jnp.swapaxes(v_ref[...].reshape(block_kv, H, hd), 0, 1)    # (H, bkv, hd)
        # Batched (per-head) QK^T contracting the last dims, batch leading.
        s = jax.lax.dot_general(q, k, (((2,), (2,)), ((0,), (0,))),
                                preferred_element_type=jnp.float32)    # (H, bq, bkv)
        if apply_mask:  # only emitted for diagonal tiles
            rows = q_start + jax.lax.broadcasted_iota(jnp.int32, s.shape, 1)
            cols = kv_start + jax.lax.broadcasted_iota(jnp.int32, s.shape, 2)
            s = jnp.where(cols <= rows, s, _MASK_VALUE)

        m_prev = m_ref[...]                                            # (H, bq, 1)
        m_new = jnp.maximum(m_prev, jnp.max(s, axis=-1, keepdims=True))
        alpha = jnp.exp(m_prev - m_new)
        p = jnp.exp(s - m_new)
        l_ref[...] = alpha * l_ref[...] + jnp.sum(p, axis=-1, keepdims=True)
        acc_ref[...] = alpha * acc_ref[...] + jax.lax.dot_general(
            p.astype(v.dtype), v, (((2,), (1,)), ((0,), (0,))),
            preferred_element_type=jnp.float32)                        # (H, bq, hd)
        m_ref[...] = m_new

    # Causal tile classification:
    #   fully visible -> no mask work; diagonal -> per-tile iota mask;
    #   fully masked  -> skip compute entirely (K/V DMA is also skipped via the
    #                    clamped index_map in the wrapper).
    fully_visible = kv_start + block_kv - 1 <= q_start
    on_diagonal = jnp.logical_and(kv_start <= q_start + block_q - 1,
                                  kv_start + block_kv - 1 > q_start)

    @pl.when(fully_visible)
    def _no_mask():
        update(apply_mask=False)

    @pl.when(on_diagonal)
    def _with_mask():
        update(apply_mask=True)

    @pl.when(kj == pl.num_programs(2) - 1)
    def _finalize():
        # Exact reciprocal for f32 outputs; approx (EUP) is fine at bf16 precision.
        inv_l = pl.reciprocal(l_ref[...], approx=(o_ref.dtype != jnp.float32))
        out = (acc_ref[...] * inv_l).astype(o_ref.dtype)               # (H, bq, hd)
        o_ref[...] = jnp.swapaxes(out, 0, 1).reshape(o_ref.shape)      # (1, bq, H, hd)


def _flash_attention(qkv5, *, block_q=None, block_kv=None):
    B, T, three, H, hd = qkv5.shape
    assert three == 3
    block_q = block_q or _largest_divisor_tile(T, 512)
    block_kv = block_kv or _largest_divisor_tile(T, 256)
    assert T % block_q == 0 and T % block_kv == 0

    def q_map(b, i, j):
        return (b, i, 0, 0, 0)

    def kv_map(sel):
        def index_map(b, i, j):
            # Clamp to the last causally-needed KV tile: fully-masked tiles re-use the
            # previous block index, so Pallas skips their DMAs (no wasted HBM traffic).
            j_needed = (i * block_q + block_q - 1) // block_kv
            return (b, jnp.minimum(j, j_needed), sel, 0, 0)
        return index_map

    return pl.pallas_call(
        _flash_attn_kernel,
        out_shape=jax.ShapeDtypeStruct((B, T, H, hd), qkv5.dtype),
        grid_spec=pltpu.PrefetchScalarGridSpec(
            num_scalar_prefetch=0,
            grid=(B, T // block_q, T // block_kv),
            in_specs=[
                pl.BlockSpec((1, block_q, 1, H, hd), q_map),       # q  (sel 0)
                pl.BlockSpec((1, block_kv, 1, H, hd), kv_map(1)),  # k  (sel 1)
                pl.BlockSpec((1, block_kv, 1, H, hd), kv_map(2)),  # v  (sel 2)
            ],
            out_specs=pl.BlockSpec((1, block_q, H, hd), lambda b, i, j: (b, i, 0, 0)),
            scratch_shapes=[
                pltpu.VMEM((H, block_q, hd), qkv5.dtype),   # staged, pre-scaled q
                pltpu.VMEM((H, block_q, 1), jnp.float32),   # running max m
                pltpu.VMEM((H, block_q, 1), jnp.float32),   # running sum l
                pltpu.VMEM((H, block_q, hd), jnp.float32),  # output accumulator
            ],
        ),
        compiler_params=pltpu.CompilerParams(
            dimension_semantics=("parallel", "parallel", "arbitrary"),
            vmem_limit_bytes=_FLASH_VMEM_LIMIT,
        ),
    )(qkv5, qkv5, qkv5)


# ---------------------------------------------------------------------------
# Full forward: c_attn -> causal attention -> c_proj
# ---------------------------------------------------------------------------
def causal_self_attention(x, w_qkv, b_qkv, w_proj, b_proj, *, n_head,
                          compute_dtype=None, attn_block_q=None, attn_block_kv=None):
    B, T, C = x.shape
    assert C % n_head == 0
    hd = C // n_head
    cdt = compute_dtype if compute_dtype is not None else x.dtype

    # For best perf keep parameters stored in `compute_dtype` (these casts become no-ops;
    # per-call weight casts are a full HBM pass over the weights otherwise).
    if w_qkv.dtype != cdt:
        w_qkv, b_qkv = w_qkv.astype(cdt), b_qkv.astype(cdt)
    if w_proj.dtype != cdt:
        w_proj, b_proj = w_proj.astype(cdt), b_proj.astype(cdt)

    # --- QKV projection (c_attn) ---
    qkv = _linear(x.reshape(B * T, C).astype(cdt), w_qkv, b_qkv, out_dtype=cdt)

    # --- causal flash attention straight off the qkv buffer ---
    # (B*T, 3C) -> (B, T, 3, H, hd) is a FREE reshape: no split / transpose copies.
    y = _flash_attention(qkv.reshape(B, T, 3, n_head, hd),
                         block_q=attn_block_q, block_kv=attn_block_kv)   # (B, T, H, hd)

    # --- merge heads (free reshape) + output projection (c_proj) ---
    out = _linear(y.reshape(B * T, C), w_proj, b_proj, out_dtype=x.dtype)
    return out.reshape(B, T, C)


# ---------------------------------------------------------------------------
# Pure-JAX reference (replica of the PyTorch forward) for verification
# ---------------------------------------------------------------------------
def _reference(x, w_qkv, b_qkv, w_proj, b_proj, n_head):
    B, T, C = x.shape
    hd = C // n_head
    qkv = x @ w_qkv + b_qkv                       # (B, T, 3C)
    q, k, v = jnp.split(qkv, 3, axis=-1)
    q = q.reshape(B, T, n_head, hd).transpose(0, 2, 1, 3)
    k = k.reshape(B, T, n_head, hd).transpose(0, 2, 1, 3)
    v = v.reshape(B, T, n_head, hd).transpose(0, 2, 1, 3)
    att = jnp.einsum("bhqd,bhkd->bhqk", q, k) / math.sqrt(hd)
    mask = jnp.tril(jnp.ones((T, T), dtype=bool))
    att = jnp.where(mask[None, None], att, -jnp.inf)
    att = jax.nn.softmax(att, axis=-1)
    y = jnp.einsum("bhqk,bhkd->bhqd", att, v)
    y = y.transpose(0, 2, 1, 3).reshape(B, T, C)
    return y @ w_proj + b_proj


if __name__ == "__main__":
    def run_case(B, T, C, n_head, compute_dtype, atol, rtol, bq=None, bkv=None):
        key = jax.random.PRNGKey(0)
        kx, k1, k2, k3, k4 = jax.random.split(key, 5)
        x = jax.random.normal(kx, (B, T, C), dtype=jnp.float32)
        # Deterministic synthetic parameters (~GPT-2 style 0.02 std).
        w_qkv = 0.02 * jax.random.normal(k1, (C, 3 * C), dtype=jnp.float32)
        b_qkv = 0.02 * jax.random.normal(k2, (3 * C,), dtype=jnp.float32)
        w_proj = 0.02 * jax.random.normal(k3, (C, C), dtype=jnp.float32)
        b_proj = 0.02 * jax.random.normal(k4, (C,), dtype=jnp.float32)

        # Cast parameters to the compute dtype ONCE, outside the forward (hoisted).
        params = tuple(p.astype(compute_dtype) for p in (w_qkv, b_qkv, w_proj, b_proj))
        out = causal_self_attention(x, *params, n_head=n_head,
                                    compute_dtype=compute_dtype,
                                    attn_block_q=bq, attn_block_kv=bkv)
        out = jax.block_until_ready(out)
        ref = _reference(x, w_qkv, b_qkv, w_proj, b_proj, n_head)
        assert out.shape == (B, T, C)
        assert jnp.allclose(out.astype(jnp.float32), ref, atol=atol, rtol=rtol), (
            f"mismatch vs JAX reference (B={B},T={T},C={C},dtype={compute_dtype})")

    # Small config from the module spec (n_embd=32, n_head=4, seq=8).
    run_case(2, 8, 32, 4, jnp.float32, 2e-3, 2e-3)
    # Config exercising real (8,128) tiling, multi-tile causal grid, tile-skip + DMA clamp.
    run_case(2, 256, 128, 4, jnp.float32, 2e-3, 2e-3, bq=128, bkv=128)
    # bf16 MXU fast path with f32 accumulation.
    run_case(2, 128, 128, 4, jnp.bfloat16, 3e-2, 3e-2)

    print("KERNEL_OK")
</pallas_src>

<mosaic_0001>
module attributes {stable_mosaic.version = 11 : i64} {
  func.func @_linear_kernel(%arg0: i32, %arg1: i32, %arg2: i32, %arg3: memref<16x32xf32, #tpu.memory_space<vmem>>, %arg4: memref<32x96xf32, #tpu.memory_space<vmem>>, %arg5: memref<1x96xf32, #tpu.memory_space<vmem>>, %arg6: memref<16x96xf32, #tpu.memory_space<vmem>>, %arg7: memref<16x96xf32, #tpu.memory_space<vmem>>) attributes {dimension_semantics = [#tpu.dimension_semantics<parallel>, #tpu.dimension_semantics<parallel>, #tpu.dimension_semantics<arbitrary>], iteration_bounds = array<i64: 1, 1, 1>, scalar_prefetch = 0 : i64, scratch_operands = 1 : i64, tpu.core_type = #tpu.core_type<tc>, window_params = [{transform_indices = @transform_0, window_bounds = array<i64: 16, 32>}, {transform_indices = @transform_1, window_bounds = array<i64: 32, 96>}, {transform_indices = @transform_2, window_bounds = array<i64: 1, 96>}, {transform_indices = @transform_3, window_bounds = array<i64: 16, 96>}]} {
    %c0_i32 = arith.constant 0 : i32
    %0 = arith.cmpi eq, %arg2, %c0_i32 : i32
    %1 = arith.extui %0 : i1 to i32
    %c0_i32_0 = arith.constant 0 : i32
    %2 = arith.cmpi ne, %1, %c0_i32_0 : i32
    scf.if %2 {
      %cst_10 = arith.constant 0.000000e+00 : f32
      %12 = vector.broadcast %cst_10 : f32 to vector<16x96xf32>
      %c0_11 = arith.constant 0 : index
      %c0_12 = arith.constant 0 : index
      %13 = vector.load %arg7[%c0_11, %c0_12] : memref<16x96xf32, #tpu.memory_space<vmem>>, vector<16x96xf32>
      tpu.vector_store %arg7[%c0_11, %c0_12], %12 {strides = array<i32>} : memref<16x96xf32, #tpu.memory_space<vmem>>, vector<16x96xf32>,
    } else {
    }
    %c0 = arith.constant 0 : index
    %c0_1 = arith.constant 0 : index
    %3 = vector.load %arg7[%c0, %c0_1] : memref<16x96xf32, #tpu.memory_space<vmem>>, vector<16x96xf32>
    %c0_2 = arith.constant 0 : index
    %c0_3 = arith.constant 0 : index
    %4 = vector.load %arg3[%c0_2, %c0_3] : memref<16x32xf32, #tpu.memory_space<vmem>>, vector<16x32xf32>
    %c0_4 = arith.constant 0 : index
    %c0_5 = arith.constant 0 : index
    %5 = vector.load %arg4[%c0_4, %c0_5] : memref<32x96xf32, #tpu.memory_space<vmem>>, vector<32x96xf32>
    %cst = arith.constant dense<0.000000e+00> : vector<16x96xf32>
    %6 = tpu.matmul %4, %5, %cst {dimension_numbers = #tpu.dot_dimension_numbers<[1], [0], [0], [1], [0, 0, 1, 1], [], []>} : vector<16x32xf32>, vector<32x96xf32>, vector<16x96xf32> -> vector<16x96xf32>
    %7 = arith.addf %3, %6 : vector<16x96xf32>
    %c0_6 = arith.constant 0 : index
    %c0_7 = arith.constant 0 : index
    %8 = vector.load %arg7[%c0_6, %c0_7] : memref<16x96xf32, #tpu.memory_space<vmem>>, vector<16x96xf32>
    tpu.vector_store %arg7[%c0_6, %c0_7], %7 {strides = array<i32>} : memref<16x96xf32, #tpu.memory_space<vmem>>, vector<16x96xf32>,
    %c0_i32_8 = arith.constant 0 : i32
    %9 = arith.cmpi eq, %arg2, %c0_i32_8 : i32
    %10 = arith.extui %9 : i1 to i32
    %c0_i32_9 = arith.constant 0 : i32
    %11 = arith.cmpi ne, %10, %c0_i32_9 : i32
    scf.if %11 {
      %c0_10 = arith.constant 0 : index
      %c0_11 = arith.constant 0 : index
      %12 = vector.load %arg7[%c0_10, %c0_11] : memref<16x96xf32, #tpu.memory_space<vmem>>, vector<16x96xf32>
      %c0_12 = arith.constant 0 : index
      %c0_13 = arith.constant 0 : index
      %13 = vector.load %arg5[%c0_12, %c0_13] : memref<1x96xf32, #tpu.memory_space<vmem>>, vector<1x96xf32>
      %14 = vector.broadcast %13 : vector<1x96xf32> to vector<16x96xf32>
      %15 = arith.addf %12, %14 : vector<16x96xf32>
      %c0_14 = arith.constant 0 : index
      %c0_15 = arith.constant 0 : index
      %16 = vector.load %arg6[%c0_14, %c0_15] : memref<16x96xf32, #tpu.memory_space<vmem>>, vector<16x96xf32>
      tpu.vector_store %arg6[%c0_14, %c0_15], %15 {strides = array<i32>} : memref<16x96xf32, #tpu.memory_space<vmem>>, vector<16x96xf32>,
    } else {
    }
    return
  }
  func.func @transform_0(%arg0: i32, %arg1: i32, %arg2: i32) -> (i32, i32) {
    %c0_i32 = arith.constant 0 : i32
    return %arg0, %arg2 : i32, i32
  }
  func.func @transform_1(%arg0: i32, %arg1: i32, %arg2: i32) -> (i32, i32) {
    %c0_i32 = arith.constant 0 : i32
    return %arg2, %arg1 : i32, i32
  }
  func.func @transform_2(%arg0: i32, %arg1: i32, %arg2: i32) -> (i32, i32) {
    %c0_i32 = arith.constant 0 : i32
    %c0_i32_0 = arith.constant 0 : i32
    return %c0_i32, %arg1 : i32, i32
  }
  func.func @transform_3(%arg0: i32, %arg1: i32, %arg2: i32) -> (i32, i32) {
    %c0_i32 = arith.constant 0 : i32
    return %arg0, %arg1 : i32, i32
  }
}

</mosaic_0001>

<bundles_post_ra>
// kernel: tpu_custom_call.1
= control target key start
LH: loop header
LB: loop body
LE: loop exit
PB: predicated region body
PF: predicated region fallthrough
CT: control target
= control target key end

     0   :  { %8 = vsyncpa [#allocation4], 0  ;;  %s365_s0 = inlined_call_operand.hbm [shape: f32[16,32], index: 0, kind: input, shape index: {}]   ;;  %s366_s1 = inlined_call_operand.hbm [shape: f32[32,96], index: 1, kind: input, shape index: {}]   ;;  %s367_s2 = inlined_call_operand.vmem [shape: f32[1,96], index: 2, kind: input, shape index: {}]   ;;  %s368_s3 = inlined_call_operand.hbm [shape: f32[16,96], index: 3, kind: output, shape index: {}]  }
   0x1   :  { %9 = vsyncpa [#allocation7], 0 }
   0x2   :  { %10 = vsyncpa [#allocation5], 0  ;;  %s285_s12 = smov [#allocation3]   ;;  %s213_s16 = scalar_lea.hbm %s365_s0, 256 }
   0x3   :  { %s16_s13 = sshll.u32 %s285_s12, 4  ;;  %p214_p0 = scmp.ne.s32.totalorder %s365_s0, %s213_s16  ;;  %s17_s13 = int_to_ptr.vmem [resolvable:$true] %s16_s13 }
   0x4   :  { %p217_p1 = scmp.lt.u32.totalorder %s213_s16, %s365_s0 }
   0x6   :  { %p219_p2 = pnand %p217_p1, %p214_p0 }
   0x8   :  { %222 = shalt.err (!%p219_p2)
}
   0x9   :  { %s223_s21 = scalar_lea.vmem %s17_s13, 256  ;;  %p228_p4 = scmp.lt.s32.totalorder %s17_s13, %s17_s13 }
   0xa   :  { %p224_p3 = scmp.ne.s32.totalorder %s17_s13, %s223_s21  ;;  %p229_p5 = scmp.lt.s32.totalorder %s223_s21, %s223_s21 }
   0xc   :  { %p230_p6 = por %p229_p5, %p228_p4 }
   0xe   :  { %p231_p7 = pnand %p230_p6, %p224_p3 }
  0x10   :  { %234 = shalt.err (!%p231_p7)
}
  0x11   :  { %s286_s22 = smov 128   ;;  %s287_s23 = smov 8  }
  0x12   :  { %22 = dma.hbm_to_vmem [thread:$0]  %s365_s0, 256, %s17_s13, [#allocation4], %s286_s22, %s286_s22, %s287_s23  }
  0x13   :  { %s288_s26 = smov [#allocation6]   ;;  %s235_s30 = scalar_lea.hbm %s366_s1, 512 }
  0x14   :  { %s28_s27 = sshll.u32 %s288_s26, 4  ;;  %p236_p8 = scmp.ne.s32.totalorder %s366_s1, %s235_s30  ;;  %s29_s27 = int_to_ptr.vmem [resolvable:$true] %s28_s27 }
  0x15   :  { %p239_p9 = scmp.lt.u32.totalorder %s235_s30, %s366_s1 }
  0x17   :  { %p241_p10 = pnand %p239_p9, %p236_p8 }
  0x19   :  { %244 = shalt.err (!%p241_p10)
}
  0x1a   :  { %s245_s8 = scalar_lea.vmem %s29_s27, 512  ;;  %p250_p12 = scmp.lt.s32.totalorder %s29_s27, %s29_s27 }
  0x1b   :  { %p246_p11 = scmp.ne.s32.totalorder %s29_s27, %s245_s8  ;;  %p251_p13 = scmp.lt.s32.totalorder %s245_s8, %s245_s8 }
  0x1d   :  { %p252_p0 = por %p251_p13, %p250_p12 }
  0x1f   :  { %p253_p1 = pnand %p252_p0, %p246_p11 }
  0x21   :  { %256 = shalt.err (!%p253_p1)
}
  0x22   :  { %34 = dma.hbm_to_vmem [thread:$0]  %s366_s1, 512, %s29_s27, [#allocation7], %s286_s22, %s286_s22, %s287_s23  }
  0x23   :  { %279 = dma.done.wait [#allocation4], 256  }
  0x24   :  { %280 = vsyncadd [#allocation4], 4294967040 }
  0x25   :  { %281 = dma.done.wait [#allocation7], 512  }
  0x26   :  { %282 = vsyncadd [#allocation7], 4294966784  ;;  %vm47_vm0 = vcmask 785408   ;;  %v289_v0 = vmov 0.0   ;;  %vm58_vm1 = vcmask 261120   ;;  %v54_v1 = vld [vmem:[#allocation6] sm:$0xff] }
  0x27   :  { %49 = vst.msk [vmem:[#allocation2 + $0x8] sm:$0xff] %vm47_vm0, %v289_v0  ;;  %48 = vst.msk [vmem:[#allocation2] sm:$0xff] %vm47_vm0, %v289_v0  ;;  %v55_v2 = vld [vmem:[#allocation6 + $0x8] sm:$0xff]  ;;  %v56_v3 = vld [vmem:[#allocation6 + $0x10] sm:$0xff]  ;;  %s290_s11 = smov [#allocation8]  }
  0x28   :  { %v199_v4 = vpack.c.bf16 %v55_v2, %v54_v1  ;;  %v57_v5 = vld [vmem:[#allocation6 + $0x18] sm:$0xff]  ;;  %v52_v6 = vld [vmem:[#allocation3] sm:$0xff]  ;;  %v181_v15 = vld [vmem:[%s367_s2] ss:$0 sm:$0xff]  ;;  %s166_s12 = sshll.u32 %s290_s11, 4  ;;  %s167_s12 = int_to_ptr.vmem [resolvable:$true] %s166_s12 }
  0x29   :  { %v203_v7 = vpack.c.bf16 %v57_v5, %v56_v3  ;;  %196 = vmatprep.mubr.msk.f32.mxu0 %vm58_vm1, %v52_v6  ;;  %v53_v8 = vld [vmem:[#allocation3 + $0x8] sm:$0xff]  ;;  %s257_s13 = scalar_lea.vmem %s167_s12, 256  ;;  %p262_p3 = scmp.lt.s32.totalorder %s167_s12, %s167_s12 }
  0x2a   :  { %200 = vmatprep.subr.bf16.mxu0 %v199_v4  ;;  %p258_p2 = scmp.ne.s32.totalorder %s167_s12, %s257_s13  ;;  %p263_p4 = scmp.lt.s32.totalorder %s257_s13, %s257_s13 }
  0x2b   :  { %202 = vmatpush3.bf16.msra.mxu0 %v199_v4 }
  0x2c   :  { %204 = vmatprep.subr.bf16.mxu0 %v203_v7  ;;  %p264_p5 = por %p263_p4, %p262_p3 }
  0x2e   :  { %v51_v9 = vld [vmem:[#allocation2 + $0x8] sm:$0xff]  ;;  %v50_v10 = vld [vmem:[#allocation2] sm:$0xff]  ;;  %p265_p6 = pnand %p264_p5, %p258_p2 }
  0x2f   :  { %206 = vmatpush3.bf16.msra.mxu0 %v203_v7 }
  0x32   :  { %197 = vmatmul.mubr.msk.f32.vlgmr.msra.gmra.mrb[0].mxu0 %vm58_vm1, %v53_v8 }
 0x105   :  { %v198_v11 = vpop.f32.mrb[0].mxu0 }
 0x106   :  { %v141_v12 = vadd.f32 %v198_v11, %v51_v9  ;;  %v131_v13 = vpop.f32.mrb[1].mxu0 }
 0x107   :  { %v140_v14 = vadd.f32 %v131_v13, %v50_v10 }
 0x108   :  { %144 = vst.msk [vmem:[#allocation2 + $0x8] sm:$0xff] %vm47_vm0, %v141_v12 }
 0x109   :  { %143 = vst.msk [vmem:[#allocation2] sm:$0xff] %vm47_vm0, %v140_v14 }
 0x10f   :  { %v149_v16 = vld [vmem:[#allocation2 + $0x8] sm:$0xff] }
 0x110   :  { %v148_v17 = vld [vmem:[#allocation2] sm:$0xff]  ;;  %v158_v18 = vadd.f32 %v181_v15, %v149_v16 }
 0x111   :  { %v157_v19 = vadd.f32 %v181_v15, %v148_v17 }
 0x112   :  { %160 = vst.msk [vmem:[#allocation8 + $0x8] sm:$0xff] %vm47_vm0, %v158_v18 }
 0x113   :  { %159 = vst.msk [vmem:[#allocation8] sm:$0xff] %vm47_vm0, %v157_v19 }
 0x114   :  { %268 = shalt.err (!%p265_p6)
}
 0x115   :  { %s269_s15 = scalar_lea.hbm %s368_s3, 256 }
 0x116   :  { %p270_p7 = scmp.ne.s32.totalorder %s368_s3, %s269_s15  ;;  %p273_p8 = scmp.lt.u32.totalorder %s269_s15, %s368_s3 }
 0x118   :  { %p275_p9 = pnand %p273_p8, %p270_p7 }
 0x11a   :  { %278 = shalt.err (!%p275_p9)
}
 0x11b   :  { %172 = dma.vmem_to_hbm [thread:$0]  %s167_s12, 256, %s368_s3, [#allocation5], %s286_s22, %s286_s22, %s287_s23  }
 0x11c   :  { %283 = dma.done.wait [#allocation5], 256  }
 0x11d   :  { %284 = vsyncadd [#allocation5], 4294967040 }
 0x11e   :  { %176 = vsyncpa [#allocation4], 1 }
 0x11f   :  { %177 = vsyncpa [#allocation7], 1 }
 0x120   :  { %178 = vsyncpa [#allocation5], 1 }

</bundles_post_ra>
